<compile_context>
chip_gen: v7x
topology: tpu7x:2x2x1
jax: 0.10.0
libtpu: 0.0.40
codegen_flags: <defaults>
</compile_context>

<pallas_src>
import math
import functools

import jax
import jax.numpy as jnp
from jax.experimental import pallas as pl
from jax.experimental.pallas import tpu as pltpu


def _round_up(x, m):
    return ((x + m - 1) // m) * m


def _choose_tile(dim, align, candidates):
    """Pick a tile size for `dim`.

    If the (alignment-rounded) dim fits in one max-size tile, use exactly that
    (single tile, minimal padding).  Otherwise pick the LARGEST candidate whose
    total padded extent is within ~6% of the minimum achievable padding
    (larger tiles cut HBM re-streaming of the other operand)."""
    if dim <= candidates[0]:
        return _round_up(dim, align)
    best_pad = min(_round_up(dim, c) for c in candidates)
    for c in candidates:                       # descending order
        if _round_up(dim, c) <= best_pad + best_pad // 16:
            return c
    return candidates[-1]


def _affine_bias_kernel(x_ref, w_ref, b_ref, o_ref, acc_ref):
    # x_ref: (tm, tk)  w_ref: (tk, tn)  b_ref: (1, tn)  o_ref/acc_ref: (tm, tn)
    @pl.when(pl.program_id(2) == 0)
    def _():
        # Fold the bias into the accumulator init -> no epilogue add.
        acc_ref[...] = jnp.broadcast_to(
            b_ref[...].astype(jnp.float32), acc_ref.shape)

    acc_ref[...] += jnp.dot(x_ref[...], w_ref[...],
                            preferred_element_type=jnp.float32)

    @pl.when(pl.program_id(2) == pl.num_programs(2) - 1)
    def _():
        o_ref[...] = acc_ref[...].astype(o_ref.dtype)


def _affine_nobias_kernel(x_ref, w_ref, o_ref, acc_ref):
    @pl.when(pl.program_id(2) == 0)
    def _():
        acc_ref[...] = jnp.zeros_like(acc_ref)

    acc_ref[...] += jnp.dot(x_ref[...], w_ref[...],
                            preferred_element_type=jnp.float32)

    @pl.when(pl.program_id(2) == pl.num_programs(2) - 1)
    def _():
        o_ref[...] = acc_ref[...].astype(o_ref.dtype)


# Portable per-invocation VMEM budget for the double-buffered tiles + f32
# accumulator.  Comfortably under v5e's 16 MiB scoped default once we raise
# the limit explicitly, and well under v7x's 64 MiB physical VMEM.
_VMEM_TILE_BUDGET = 14 * (1 << 20)
_VMEM_LIMIT_BYTES = 32 * (1 << 20)   # valid on v5e/v6e (128 MiB) and v7x (64 MiB)


@jax.jit
def _affine_impl(x, weight, bias):
    out_features, in_features = weight.shape
    orig_shape = x.shape
    xm = x.reshape(-1, in_features)
    m = xm.shape[0]

    in_itemsize = jnp.dtype(x.dtype).itemsize
    w_itemsize = jnp.dtype(weight.dtype).itemsize
    out_itemsize = in_itemsize
    # Sublane alignment for row tiles: f32 -> 8, bf16 -> 16, int8/fp8 -> 32.
    sub = max(8, 32 // in_itemsize)

    # --- Tile selection (padding-aware, VMEM-budgeted) --------------------
    tm = _choose_tile(m, sub, [512, 384, 256, 128, 64])
    tn = _choose_tile(out_features, 128, [512, 384, 256, 128])

    # Pick tk as large as the VMEM budget allows (up to 2048).
    fixed = 2 * tm * tn * out_itemsize + tm * tn * 4 + 2 * tn * 4
    per_tk = 2 * (tm * in_itemsize + tn * w_itemsize)
    tk_cap = max(128, min(2048, ((_VMEM_TILE_BUDGET - fixed) // per_tk)
                          // 128 * 128))
    tk_cands = [c for c in (2048, 1536, 1024, 768, 512, 384, 256, 128)
                if c <= tk_cap]
    tk = _choose_tile(in_features, 128, tk_cands)

    m_pad = _round_up(m, tm)
    n_pad = _round_up(out_features, tn)
    k_pad = _round_up(in_features, tk)
    m_tiles, n_tiles, k_tiles = m_pad // tm, n_pad // tn, k_pad // tk

    # --- Operand prep: pad x, transpose+pad W to (K, N) --------------------
    if (m_pad, k_pad) != (m, in_features):
        xm = jnp.pad(xm, ((0, m_pad - m), (0, k_pad - in_features)))
    wt = weight.T                                   # (K, N), one-time pass
    if (k_pad, n_pad) != (in_features, out_features):
        wt = jnp.pad(wt, ((0, k_pad - in_features), (0, n_pad - out_features)))

    has_bias = bias is not None
    if has_bias:
        bp = bias
        if n_pad != out_features:
            bp = jnp.pad(bias, (0, n_pad - out_features))
        bp = bp.reshape(1, n_pad)

    # --- Grid: K innermost (reduction); larger of M/N tiles outermost so the
    # outer "parallel" axis has >= 2 blocks for v7x's two TensorCores. ------
    if n_tiles >= m_tiles:
        grid = (n_tiles, m_tiles, k_tiles)
        x_map = lambda n, mi, k: (mi, k)
        w_map = lambda n, mi, k: (k, n)
        b_map = lambda n, mi, k: (0, n)
        o_map = lambda n, mi, k: (mi, n)
    else:
        grid = (m_tiles, n_tiles, k_tiles)
        x_map = lambda mi, n, k: (mi, k)
        w_map = lambda mi, n, k: (k, n)
        b_map = lambda mi, n, k: (0, n)
        o_map = lambda mi, n, k: (mi, n)

    in_specs = [pl.BlockSpec((tm, tk), x_map),
                pl.BlockSpec((tk, tn), w_map)]
    operands = [xm, wt]
    if has_bias:
        in_specs.append(pl.BlockSpec((1, tn), b_map))
        operands.append(bp)
        kernel = _affine_bias_kernel
    else:
        kernel = _affine_nobias_kernel

    # Bytes account for re-streaming: x read once per N tile, W once per M tile.
    cost = pl.CostEstimate(
        flops=2 * m_pad * k_pad * n_pad,
        transcendentals=0,
        bytes_accessed=(n_tiles * m_pad * k_pad * in_itemsize
                        + m_tiles * k_pad * n_pad * w_itemsize
                        + m_pad * n_pad * out_itemsize
                        + (n_pad * jnp.dtype(bias.dtype).itemsize
                           if has_bias else 0)),
    )

    out = pl.pallas_call(
        kernel,
        out_shape=jax.ShapeDtypeStruct((m_pad, n_pad), x.dtype),
        grid_spec=pltpu.PrefetchScalarGridSpec(
            num_scalar_prefetch=0,
            grid=grid,
            in_specs=in_specs,
            out_specs=pl.BlockSpec((tm, tn), o_map),
            scratch_shapes=[pltpu.VMEM((tm, tn), jnp.float32)],
        ),
        compiler_params=pltpu.CompilerParams(
            dimension_semantics=("parallel", "parallel", "arbitrary"),
            vmem_limit_bytes=_VMEM_LIMIT_BYTES),
        cost_estimate=cost,
    )(*operands)

    out = out[:m, :out_features]
    return out.reshape(*orig_shape[:-1], out_features)


def affine(x, weight, bias=None):
    """Pallas equivalent of torch.nn.functional.linear(x, weight, bias).

    x:      (..., in_features)
    weight: (out_features, in_features)   -- PyTorch convention
    bias:   (out_features,) or None       -- None skips the bias DMA entirely
    """
    return _affine_impl(x, weight, bias)


def init_affine_params(key, in_features, out_features, dtype=jnp.float32):
    """Replica of Affine.reset_parameters(): kaiming_uniform_(a=sqrt(5)) on the
    weight == U(-1/sqrt(fan_in), 1/sqrt(fan_in)); bias ~ same bound."""
    kw, kb = jax.random.split(key)
    bound = 1.0 / math.sqrt(in_features)
    weight = jax.random.uniform(
        kw, (out_features, in_features), dtype=dtype, minval=-bound, maxval=bound)
    bias = jax.random.uniform(
        kb, (out_features,), dtype=dtype, minval=-bound, maxval=bound)
    return weight, bias


if __name__ == "__main__":
    key = jax.random.PRNGKey(0)
    k_x, k_p = jax.random.split(key)

    # 1) Small shape implied by the module (seq model hidden sizes).
    batch, seq, in_features, out_features = 2, 8, 32, 64
    x = jax.random.normal(k_x, (batch, seq, in_features), dtype=jnp.float32)
    weight, bias = init_affine_params(k_p, in_features, out_features)
    y = jax.block_until_ready(affine(x, weight, bias))
    y_ref = jnp.einsum("bsi,oi->bso", x, weight) + bias
    assert y.shape == (batch, seq, out_features)
    assert jnp.allclose(y, y_ref, atol=1e-5, rtol=1e-5)

    # 2) bias=None path (no bias operand / DMA at all).
    y_nb = jax.block_until_ready(affine(x, weight))
    assert jnp.allclose(y_nb, jnp.einsum("bsi,oi->bso", x, weight),
                        atol=1e-5, rtol=1e-5)

    # 3) Multi-tile M and N grid (640 rows x 640 outputs, 256 inputs).
    k_x2, k_p2 = jax.random.split(k_x)
    x2 = jax.random.normal(k_x2, (4, 160, 256), dtype=jnp.float32)
    w2, b2 = init_affine_params(k_p2, 256, 640)
    y2 = jax.block_until_ready(affine(x2, w2, b2))
    y2_ref = jnp.einsum("bsi,oi->bso", x2, w2) + b2
    assert jnp.allclose(y2, y2_ref, atol=1e-4, rtol=1e-4)

    # 4) Multi-K-tile reduction path (in_features > tk -> accumulate across K).
    k_x3, k_p3 = jax.random.split(k_x2)
    x3 = jax.random.normal(k_x3, (2, 8, 2304), dtype=jnp.float32)
    w3, b3 = init_affine_params(k_p3, 2304, 128)
    y3 = jax.block_until_ready(affine(x3, w3, b3))
    y3_ref = jnp.einsum("bsi,oi->bso", x3, w3) + b3
    assert jnp.allclose(y3, y3_ref, atol=1e-3, rtol=1e-4)

    print("KERNEL_OK")
</pallas_src>

<mosaic_0001>
module attributes {stable_mosaic.version = 11 : i64} {
  func.func @_affine_bias_kernel(%arg0: i32, %arg1: i32, %arg2: i32, %arg3: memref<16x128xf32, #tpu.memory_space<vmem>>, %arg4: memref<128x128xf32, #tpu.memory_space<vmem>>, %arg5: memref<1x128xf32, #tpu.memory_space<vmem>>, %arg6: memref<16x128xf32, #tpu.memory_space<vmem>>, %arg7: memref<16x128xf32, #tpu.memory_space<vmem>>) attributes {dimension_semantics = [#tpu.dimension_semantics<parallel>, #tpu.dimension_semantics<parallel>, #tpu.dimension_semantics<arbitrary>], iteration_bounds = array<i64: 1, 1, 1>, scalar_prefetch = 0 : i64, scratch_operands = 1 : i64, tpu.core_type = #tpu.core_type<tc>, window_params = [{transform_indices = @transform_0, window_bounds = array<i64: 16, 128>}, {transform_indices = @transform_1, window_bounds = array<i64: 128, 128>}, {transform_indices = @transform_2, window_bounds = array<i64: 1, 128>}, {transform_indices = @transform_3, window_bounds = array<i64: 16, 128>}]} {
    %c0_i32 = arith.constant 0 : i32
    %0 = arith.cmpi eq, %arg2, %c0_i32 : i32
    %1 = arith.extui %0 : i1 to i32
    %c0_i32_0 = arith.constant 0 : i32
    %2 = arith.cmpi ne, %1, %c0_i32_0 : i32
    scf.if %2 {
      %c0_10 = arith.constant 0 : index
      %c0_11 = arith.constant 0 : index
      %12 = vector.load %arg5[%c0_10, %c0_11] : memref<1x128xf32, #tpu.memory_space<vmem>>, vector<1x128xf32>
      %13 = vector.shape_cast %12 : vector<1x128xf32> to vector<1x128xf32>
      %14 = vector.broadcast %13 : vector<1x128xf32> to vector<16x128xf32>
      %c0_12 = arith.constant 0 : index
      %c0_13 = arith.constant 0 : index
      %15 = vector.load %arg7[%c0_12, %c0_13] : memref<16x128xf32, #tpu.memory_space<vmem>>, vector<16x128xf32>
      tpu.vector_store %arg7[%c0_12, %c0_13], %14 {strides = array<i32>} : memref<16x128xf32, #tpu.memory_space<vmem>>, vector<16x128xf32>,
    } else {
    }
    %c0 = arith.constant 0 : index
    %c0_1 = arith.constant 0 : index
    %3 = vector.load %arg7[%c0, %c0_1] : memref<16x128xf32, #tpu.memory_space<vmem>>, vector<16x128xf32>
    %c0_2 = arith.constant 0 : index
    %c0_3 = arith.constant 0 : index
    %4 = vector.load %arg3[%c0_2, %c0_3] : memref<16x128xf32, #tpu.memory_space<vmem>>, vector<16x128xf32>
    %c0_4 = arith.constant 0 : index
    %c0_5 = arith.constant 0 : index
    %5 = vector.load %arg4[%c0_4, %c0_5] : memref<128x128xf32, #tpu.memory_space<vmem>>, vector<128x128xf32>
    %cst = arith.constant dense<0.000000e+00> : vector<16x128xf32>
    %6 = tpu.matmul %4, %5, %cst {dimension_numbers = #tpu.dot_dimension_numbers<[1], [0], [0], [1], [0, 0, 1, 1], [], []>} : vector<16x128xf32>, vector<128x128xf32>, vector<16x128xf32> -> vector<16x128xf32>
    %7 = arith.addf %3, %6 : vector<16x128xf32>
    %c0_6 = arith.constant 0 : index
    %c0_7 = arith.constant 0 : index
    %8 = vector.load %arg7[%c0_6, %c0_7] : memref<16x128xf32, #tpu.memory_space<vmem>>, vector<16x128xf32>
    tpu.vector_store %arg7[%c0_6, %c0_7], %7 {strides = array<i32>} : memref<16x128xf32, #tpu.memory_space<vmem>>, vector<16x128xf32>,
    %c0_i32_8 = arith.constant 0 : i32
    %9 = arith.cmpi eq, %arg2, %c0_i32_8 : i32
    %10 = arith.extui %9 : i1 to i32
    %c0_i32_9 = arith.constant 0 : i32
    %11 = arith.cmpi ne, %10, %c0_i32_9 : i32
    scf.if %11 {
      %c0_10 = arith.constant 0 : index
      %c0_11 = arith.constant 0 : index
      %12 = vector.load %arg7[%c0_10, %c0_11] : memref<16x128xf32, #tpu.memory_space<vmem>>, vector<16x128xf32>
      %c0_12 = arith.constant 0 : index
      %c0_13 = arith.constant 0 : index
      %13 = vector.load %arg6[%c0_12, %c0_13] : memref<16x128xf32, #tpu.memory_space<vmem>>, vector<16x128xf32>
      tpu.vector_store %arg6[%c0_12, %c0_13], %12 {strides = array<i32>} : memref<16x128xf32, #tpu.memory_space<vmem>>, vector<16x128xf32>,
    } else {
    }
    return
  }
  func.func @transform_0(%arg0: i32, %arg1: i32, %arg2: i32) -> (i32, i32) {
    %c0_i32 = arith.constant 0 : i32
    return %arg1, %arg2 : i32, i32
  }
  func.func @transform_1(%arg0: i32, %arg1: i32, %arg2: i32) -> (i32, i32) {
    %c0_i32 = arith.constant 0 : i32
    return %arg2, %arg0 : i32, i32
  }
  func.func @transform_2(%arg0: i32, %arg1: i32, %arg2: i32) -> (i32, i32) {
    %c0_i32 = arith.constant 0 : i32
    %c0_i32_0 = arith.constant 0 : i32
    return %c0_i32, %arg0 : i32, i32
  }
  func.func @transform_3(%arg0: i32, %arg1: i32, %arg2: i32) -> (i32, i32) {
    %c0_i32 = arith.constant 0 : i32
    return %arg1, %arg0 : i32, i32
  }
}

</mosaic_0001>

<bundles_post_ra>
// kernel: _affine_impl.1
= control target key start
LH: loop header
LB: loop body
LE: loop exit
PB: predicated region body
PF: predicated region fallthrough
CT: control target
= control target key end

     0   :  { %s306_s1 = inlined_call_operand.vmem [shape: f32[128,128], index: 1, kind: input, shape index: {}]   ;;  %s307_s0 = inlined_call_operand.vmem [shape: f32[16,128], index: 0, kind: input, shape index: {}]   ;;  %s308_s2 = inlined_call_operand.vmem [shape: f32[1,128], index: 2, kind: input, shape index: {}]   ;;  %s309_s3 = inlined_call_operand.vmem [shape: f32[16,128], index: 3, kind: output, shape index: {}]  }
   0x1   :  { %v31_v0 = vld [vmem:[%s306_s1] sm:$0xff]  ;;  %v32_v1 = vld [vmem:[%s306_s1 + $0x8] sm:$0xff]  ;;  %v33_v2 = vld [vmem:[%s306_s1 + $0x10] sm:$0xff] }
   0x2   :  { %v191_v3 = vpack.c.bf16 %v32_v1, %v31_v0  ;;  %v34_v4 = vld [vmem:[%s306_s1 + $0x18] sm:$0xff]  ;;  %v35_v6 = vld [vmem:[%s306_s1 + $0x20] sm:$0xff]  ;;  %v36_v7 = vld [vmem:[%s306_s1 + $0x28] sm:$0xff] }
   0x3   :  { %v195_v5 = vpack.c.bf16 %v34_v4, %v33_v2  ;;  %v199_v8 = vpack.c.bf16 %v36_v7, %v35_v6  ;;  %v29_v9 = vld [vmem:[%s307_s0] sm:$0xff]  ;;  %v37_v10 = vld [vmem:[%s306_s1 + $0x30] sm:$0xff]  ;;  %v38_v11 = vld [vmem:[%s306_s1 + $0x38] sm:$0xff] }
   0x4   :  { %192 = vmatprep.subr.bf16.mxu0 %v191_v3  ;;  %188 = vmatprep.mubr.f32.mxu0 %v29_v9  ;;  %v203_v12 = vpack.c.bf16 %v38_v11, %v37_v10  ;;  %v39_v13 = vld [vmem:[%s306_s1 + $0x40] sm:$0xff]  ;;  %v40_v14 = vld [vmem:[%s306_s1 + $0x48] sm:$0xff]  ;;  %v41_v16 = vld [vmem:[%s306_s1 + $0x50] sm:$0xff] }
   0x5   :  { %194 = vmatpush3.bf16.msra.mxu0 %v191_v3  ;;  %v207_v15 = vpack.c.bf16 %v40_v14, %v39_v13  ;;  %v42_v17 = vld [vmem:[%s306_s1 + $0x58] sm:$0xff]  ;;  %v43_v19 = vld [vmem:[%s306_s1 + $0x60] sm:$0xff]  ;;  %v44_v20 = vld [vmem:[%s306_s1 + $0x68] sm:$0xff] }
   0x6   :  { %196 = vmatprep.subr.bf16.mxu0 %v195_v5  ;;  %v211_v18 = vpack.c.bf16 %v42_v17, %v41_v16  ;;  %v215_v21 = vpack.c.bf16 %v44_v20, %v43_v19  ;;  %v45_v22 = vld [vmem:[%s306_s1 + $0x70] sm:$0xff]  ;;  %v46_v23 = vld [vmem:[%s306_s1 + $0x78] sm:$0xff]  ;;  %v30_v25 = vld [vmem:[%s307_s0 + $0x8] sm:$0xff] }
   0x7   :  { %v219_v24 = vpack.c.bf16 %v46_v23, %v45_v22  ;;  %v137_v26 = vld [vmem:[%s308_s2] ss:$0 sm:$0xff] }
   0x9   :  { %198 = vmatpush3.bf16.msra.mxu0 %v195_v5 }
   0xa   :  { %200 = vmatprep.subr.bf16.mxu0 %v199_v8 }
   0xd   :  { %202 = vmatpush3.bf16.msra.mxu0 %v199_v8 }
   0xe   :  { %204 = vmatprep.subr.bf16.mxu0 %v203_v12 }
  0x11   :  { %206 = vmatpush3.bf16.msra.mxu0 %v203_v12 }
  0x12   :  { %208 = vmatprep.subr.bf16.mxu0 %v207_v15 }
  0x15   :  { %210 = vmatpush3.bf16.msra.mxu0 %v207_v15 }
  0x16   :  { %212 = vmatprep.subr.bf16.mxu0 %v211_v18 }
  0x19   :  { %214 = vmatpush3.bf16.msra.mxu0 %v211_v18 }
  0x1a   :  { %216 = vmatprep.subr.bf16.mxu0 %v215_v21 }
  0x1d   :  { %218 = vmatpush3.bf16.msra.mxu0 %v215_v21 }
  0x1e   :  { %220 = vmatprep.subr.bf16.mxu0 %v219_v24 }
  0x21   :  { %222 = vmatpush3.bf16.msra.mxu0 %v219_v24 }
  0x24   :  { %189 = vmatmul.mubr.f32.vlgmr.msra.gmra.mrb[0].mxu0 %v30_v25 }
  0xf7   :  { %v190_v27 = vpop.f32.mrb[0].mxu0 }
  0xf8   :  { %v123_v28 = vadd.f32 %v190_v27, %v137_v26  ;;  %v113_v29 = vpop.f32.mrb[1].mxu0 }
  0xf9   :  { %v122_v30 = vadd.f32 %v137_v26, %v113_v29 }
  0xfa   :  { %132 = vst [vmem:[%s309_s3 + $0x8] sm:$0xff] %v123_v28 }
  0xfb   :  { %131 = vst [vmem:[%s309_s3] sm:$0xff] %v122_v30 }

</bundles_post_ra>
